<compile_context>
chip_gen: v5e
topology: v5e:2x2
jax: 0.10.0
libtpu: 0.0.40
codegen_flags: <defaults>
</compile_context>

<pallas_src>
import jax
import jax.numpy as jnp
from jax.experimental import pallas as pl
from jax.experimental.pallas import tpu as pltpu

_LANE = 128
_SUBLANE = 8


def _round_up(x, m):
    return ((x + m - 1) // m) * m


def _pad2(a, rows, cols):
    return jnp.pad(a, ((0, rows - a.shape[0]), (0, cols - a.shape[1])))


# ---------------------------------------------------------------------------
# Kernels
# ---------------------------------------------------------------------------
def _block_kernel_shortcut(x_ref, w0_ref, b0_ref, wf_ref, b1_ref, o_ref):
    """out = concat([relu(relu(x) @ w0 + b0), x]) @ [w1; ws] + b1  (fused)."""
    x = x_ref[...]
    h = jnp.maximum(x, 0)                                              # relu(x)
    net = jnp.dot(h, w0_ref[...],
                  preferred_element_type=jnp.float32) + b0_ref[...]    # fc_0
    # Fused fc_1 + shortcut: single MXU pass over the stacked weight.
    cat = jnp.concatenate(
        [jnp.maximum(net, 0.0).astype(x.dtype), x], axis=-1)
    out = jnp.dot(cat, wf_ref[...],
                  preferred_element_type=jnp.float32) + b1_ref[...]
    o_ref[...] = out.astype(o_ref.dtype)


def _block_kernel_identity(x_ref, w0_ref, b0_ref, w1_ref, b1_ref, o_ref):
    """out = x + (relu(relu(x) @ w0 + b0) @ w1 + b1)."""
    x = x_ref[...]
    h = jnp.maximum(x, 0)
    net = jnp.dot(h, w0_ref[...],
                  preferred_element_type=jnp.float32) + b0_ref[...]
    dx = jnp.dot(jnp.maximum(net, 0.0).astype(w1_ref.dtype), w1_ref[...],
                 preferred_element_type=jnp.float32) + b1_ref[...]
    o_ref[...] = (x.astype(jnp.float32) + dx).astype(o_ref.dtype)


# ---------------------------------------------------------------------------
# Wrapper
# ---------------------------------------------------------------------------
def resnet_block_fc(x, params, *, tile_m=512, compute_dtype=None):
    """Apply the ResnetBlockFC forward pass with a Pallas TPU kernel.

    x: [..., size_in]
    params: dict with w0 [size_in, size_h], b0 [size_h], w1 [size_h, size_out],
            b1 [size_out], optional ws [size_in, size_out] (weights are stored
            pre-transposed as [in, out] relative to PyTorch's [out, in]).
    compute_dtype: optional storage dtype for x / weights (e.g. jnp.bfloat16 on
            v6e/v7x); accumulation and biases stay f32.
    """
    orig_shape = x.shape
    out_dtype = x.dtype
    size_in = orig_shape[-1]
    size_h = params["w0"].shape[1]
    size_out = params["w1"].shape[1]
    has_shortcut = params.get("ws", None) is not None
    if not has_shortcut:
        assert size_in == size_out, "identity shortcut requires size_in == size_out"

    cdt = jnp.dtype(compute_dtype) if compute_dtype is not None else jnp.dtype(x.dtype)

    # ---- lane-align feature dims (zero-padded -> results are exact, stores dense)
    pad_in = _round_up(size_in, _LANE)
    pad_h = _round_up(size_h, _LANE)
    pad_out = _round_up(size_out, _LANE)

    x2 = x.reshape(-1, size_in)
    n_rows = x2.shape[0]

    # ---- row tile: large & sublane aligned; keep >=2 grid programs when
    #      possible so v7x's two TensorCores both get work.
    tile_m = max(_SUBLANE, _round_up(min(tile_m, n_rows), _SUBLANE))
    if n_rows > _SUBLANE and -(-n_rows // tile_m) < 2:
        tile_m = max(_SUBLANE, _round_up(-(-n_rows // 2), _SUBLANE))
    n_rows_pad = _round_up(n_rows, tile_m)
    grid_m = n_rows_pad // tile_m

    # ---- pad (and optionally cast) operands once in the wrapper
    xp = jnp.pad(x2, ((0, n_rows_pad - n_rows), (0, pad_in - size_in))).astype(cdt)
    w0 = _pad2(params["w0"], pad_in, pad_h).astype(cdt)
    b0 = _pad2(params["b0"].reshape(1, -1), 1, pad_h).astype(jnp.float32)
    w1 = _pad2(params["w1"], pad_h, pad_out).astype(cdt)
    b1 = _pad2(params["b1"].reshape(1, -1), 1, pad_out).astype(jnp.float32)

    full2 = lambda i: (0, 0)  # whole-array (weight / bias) blocks
    in_specs = [
        pl.BlockSpec((tile_m, pad_in), lambda i: (i, 0)),
        pl.BlockSpec((pad_in, pad_h), full2),
        pl.BlockSpec((1, pad_h), full2),
    ]
    if has_shortcut:
        ws = _pad2(params["ws"], pad_in, pad_out).astype(cdt)
        wf = jnp.concatenate([w1, ws], axis=0)          # [pad_h + pad_in, pad_out]
        k2 = pad_h + pad_in
        in_specs += [pl.BlockSpec((k2, pad_out), full2),
                     pl.BlockSpec((1, pad_out), full2)]
        args = [xp, w0, b0, wf, b1]
        kernel = _block_kernel_shortcut
    else:
        k2 = pad_h
        in_specs += [pl.BlockSpec((pad_h, pad_out), full2),
                     pl.BlockSpec((1, pad_out), full2)]
        args = [xp, w0, b0, w1, b1]
        kernel = _block_kernel_identity

    # ---- explicit VMEM budget: double-buffered x/out tiles + (double-buffered)
    #      resident weights + f32 intermediates; capped at v7x's 64 MiB.
    itemsize = cdt.itemsize
    weight_bytes = (pad_in * pad_h + k2 * pad_out) * itemsize + (pad_h + pad_out) * 4
    tile_bytes = 2 * tile_m * (pad_in * itemsize + pad_out * 4)
    interm_bytes = tile_m * (pad_h + k2 + pad_out) * 4
    vmem_limit = int(min(
        max(2 * weight_bytes + tile_bytes + interm_bytes + (4 << 20), 32 << 20),
        64 << 20))

    out = pl.pallas_call(
        kernel,
        out_shape=jax.ShapeDtypeStruct((n_rows_pad, pad_out), out_dtype),
        grid_spec=pltpu.PrefetchScalarGridSpec(
            num_scalar_prefetch=0,
            grid=(grid_m,),
            in_specs=in_specs,
            out_specs=pl.BlockSpec((tile_m, pad_out), lambda i: (i, 0)),
        ),
        compiler_params=pltpu.CompilerParams(
            dimension_semantics=("parallel",),
            vmem_limit_bytes=vmem_limit),
    )(*args)

    return out[:n_rows, :size_out].reshape(orig_shape[:-1] + (size_out,))


# ---------------------------------------------------------------------------
# Parameter init (mirrors the PyTorch module) and plain-JAX reference
# ---------------------------------------------------------------------------
def init_resnet_block_params(key, size_in, size_out=None, size_h=None):
    """Deterministic parameter init mirroring the PyTorch module's __init__."""
    if size_out is None:
        size_out = size_in
    if size_h is None:
        size_h = min(size_in, size_out)
    k0w, k0b, k1b, ksw = jax.random.split(key, 4)
    # PyTorch nn.Linear default init: U(-1/sqrt(fan_in), 1/sqrt(fan_in)).
    lim0 = 1.0 / (size_in ** 0.5)
    lim1 = 1.0 / (size_h ** 0.5)
    params = {
        # stored as [in, out] (transposed relative to PyTorch [out, in])
        "w0": jax.random.uniform(k0w, (size_in, size_h), jnp.float32, -lim0, lim0),
        "b0": jax.random.uniform(k0b, (size_h,), jnp.float32, -lim0, lim0),
        # nn.init.zeros_(self.fc_1.weight)
        "w1": jnp.zeros((size_h, size_out), jnp.float32),
        "b1": jax.random.uniform(k1b, (size_out,), jnp.float32, -lim1, lim1),
    }
    if size_in != size_out:
        params["ws"] = jax.random.uniform(ksw, (size_in, size_out),
                                          jnp.float32, -lim0, lim0)
    return params


def resnet_block_fc_ref(x, params):
    """Plain-JAX reference for correctness checking."""
    h = jnp.maximum(x, 0.0)
    net = h @ params["w0"] + params["b0"]
    dx = jnp.maximum(net, 0.0) @ params["w1"] + params["b1"]
    if params.get("ws", None) is not None:
        x_s = x @ params["ws"]
    else:
        x_s = x
    return x_s + dx


if __name__ == "__main__":
    key = jax.random.PRNGKey(0)
    kx, kx2, kp1, kp2, kw1 = jax.random.split(key, 5)

    # x: [batch=2, points=8, size_in=32]  (flattened to [16, 32] inside)
    B, P, SIZE_IN = 2, 8, 32
    x = jax.random.normal(kx, (B, P, SIZE_IN), dtype=jnp.float32)

    ok = True

    # Case 1: size_in != size_out -> shortcut Linear path (module init: fc_1.weight = 0)
    params_sc = init_resnet_block_params(kp1, size_in=SIZE_IN, size_out=48, size_h=32)
    out_sc = resnet_block_fc(x, params_sc)
    jax.block_until_ready(out_sc)
    ok &= bool(jnp.allclose(out_sc, resnet_block_fc_ref(x, params_sc),
                            atol=1e-5, rtol=1e-5))

    # Case 2: size_in == size_out -> identity shortcut path
    params_id = init_resnet_block_params(kp2, size_in=SIZE_IN)
    out_id = resnet_block_fc(x, params_id)
    jax.block_until_ready(out_id)
    ok &= bool(jnp.allclose(out_id, resnet_block_fc_ref(x, params_id),
                            atol=1e-5, rtol=1e-5))

    # Case 3: non-zero fc_1 weight + ragged row count (exercises row padding
    #         and the fused [w1; ws] matmul with both halves active).
    params_nz = dict(params_sc)
    params_nz["w1"] = 0.1 * jax.random.normal(kw1, params_sc["w1"].shape, jnp.float32)
    x_rag = jax.random.normal(kx2, (3, 5, SIZE_IN), dtype=jnp.float32)
    out_nz = resnet_block_fc(x_rag, params_nz)
    jax.block_until_ready(out_nz)
    ok &= bool(jnp.allclose(out_nz, resnet_block_fc_ref(x_rag, params_nz),
                            atol=1e-5, rtol=1e-5))

    # Case 4: bf16 storage / f32 accumulation (v6e/v7x bandwidth optimization)
    out_bf = resnet_block_fc(x_rag, params_nz, compute_dtype=jnp.bfloat16)
    jax.block_until_ready(out_bf)
    ok &= bool(jnp.allclose(out_bf, resnet_block_fc_ref(x_rag, params_nz),
                            atol=1e-1, rtol=1e-1))

    if ok:
        print("KERNEL_OK")
    else:
        raise SystemExit("mismatch vs reference")
</pallas_src>

<mosaic_0001>
module attributes {stable_mosaic.version = 11 : i64} {
  func.func @_block_kernel_shortcut(%arg0: i32, %arg1: memref<8x128xf32, #tpu.memory_space<vmem>>, %arg2: memref<128x128xf32, #tpu.memory_space<vmem>>, %arg3: memref<1x128xf32, #tpu.memory_space<vmem>>, %arg4: memref<256x128xf32, #tpu.memory_space<vmem>>, %arg5: memref<1x128xf32, #tpu.memory_space<vmem>>, %arg6: memref<8x128xf32, #tpu.memory_space<vmem>>) attributes {dimension_semantics = [#tpu.dimension_semantics<parallel>], iteration_bounds = array<i64: 2>, scalar_prefetch = 0 : i64, scratch_operands = 0 : i64, tpu.core_type = #tpu.core_type<tc>, window_params = [{transform_indices = @transform_0, window_bounds = array<i64: 8, 128>}, {pipeline_mode = #tpu.pipeline_mode<synchronous>, transform_indices = @transform_1, window_bounds = array<i64: 128, 128>}, {pipeline_mode = #tpu.pipeline_mode<synchronous>, transform_indices = @transform_2, window_bounds = array<i64: 1, 128>}, {pipeline_mode = #tpu.pipeline_mode<synchronous>, transform_indices = @transform_3, window_bounds = array<i64: 256, 128>}, {pipeline_mode = #tpu.pipeline_mode<synchronous>, transform_indices = @transform_4, window_bounds = array<i64: 1, 128>}, {transform_indices = @transform_5, window_bounds = array<i64: 8, 128>}]} {
    %c0 = arith.constant 0 : index
    %c0_0 = arith.constant 0 : index
    %0 = vector.load %arg1[%c0, %c0_0] : memref<8x128xf32, #tpu.memory_space<vmem>>, vector<8x128xf32>
    %cst = arith.constant 0.000000e+00 : f32
    %1 = vector.broadcast %cst : f32 to vector<8x128xf32>
    %2 = arith.maximumf %0, %1 : vector<8x128xf32>
    %c0_1 = arith.constant 0 : index
    %c0_2 = arith.constant 0 : index
    %3 = vector.load %arg2[%c0_1, %c0_2] : memref<128x128xf32, #tpu.memory_space<vmem>>, vector<128x128xf32>
    %cst_3 = arith.constant dense<0.000000e+00> : vector<8x128xf32>
    %4 = tpu.matmul %2, %3, %cst_3 {dimension_numbers = #tpu.dot_dimension_numbers<[1], [0], [0], [1], [0, 0, 1, 1], [], []>} : vector<8x128xf32>, vector<128x128xf32>, vector<8x128xf32> -> vector<8x128xf32>
    %c0_4 = arith.constant 0 : index
    %c0_5 = arith.constant 0 : index
    %5 = vector.load %arg3[%c0_4, %c0_5] : memref<1x128xf32, #tpu.memory_space<vmem>>, vector<1x128xf32>
    %6 = vector.broadcast %5 : vector<1x128xf32> to vector<8x128xf32>
    %7 = arith.addf %4, %6 : vector<8x128xf32>
    %cst_6 = arith.constant 0.000000e+00 : f32
    %8 = vector.broadcast %cst_6 : f32 to vector<8x128xf32>
    %9 = arith.maximumf %7, %8 : vector<8x128xf32>
    %10 = tpu.concatenate %9, %0 in 1 : vector<8x128xf32>, vector<8x128xf32> -> vector<8x256xf32>
    %c0_7 = arith.constant 0 : index
    %c0_8 = arith.constant 0 : index
    %11 = vector.load %arg4[%c0_7, %c0_8] : memref<256x128xf32, #tpu.memory_space<vmem>>, vector<256x128xf32>
    %cst_9 = arith.constant dense<0.000000e+00> : vector<8x128xf32>
    %12 = tpu.matmul %10, %11, %cst_9 {dimension_numbers = #tpu.dot_dimension_numbers<[1], [0], [0], [1], [0, 0, 1, 1], [], []>} : vector<8x256xf32>, vector<256x128xf32>, vector<8x128xf32> -> vector<8x128xf32>
    %c0_10 = arith.constant 0 : index
    %c0_11 = arith.constant 0 : index
    %13 = vector.load %arg5[%c0_10, %c0_11] : memref<1x128xf32, #tpu.memory_space<vmem>>, vector<1x128xf32>
    %14 = vector.broadcast %13 : vector<1x128xf32> to vector<8x128xf32>
    %15 = arith.addf %12, %14 : vector<8x128xf32>
    %c0_12 = arith.constant 0 : index
    %c0_13 = arith.constant 0 : index
    %16 = vector.load %arg6[%c0_12, %c0_13] : memref<8x128xf32, #tpu.memory_space<vmem>>, vector<8x128xf32>
    tpu.vector_store %arg6[%c0_12, %c0_13], %15 {strides = array<i32>} : memref<8x128xf32, #tpu.memory_space<vmem>>, vector<8x128xf32>,
    return
  }
  func.func @transform_0(%arg0: i32) -> (i32, i32) {
    %c0_i32 = arith.constant 0 : i32
    %c0_i32_0 = arith.constant 0 : i32
    return %arg0, %c0_i32 : i32, i32
  }
  func.func @transform_1(%arg0: i32) -> (i32, i32) {
    %c0_i32 = arith.constant 0 : i32
    %c0_i32_0 = arith.constant 0 : i32
    %c0_i32_1 = arith.constant 0 : i32
    return %c0_i32, %c0_i32_0 : i32, i32
  }
  func.func @transform_2(%arg0: i32) -> (i32, i32) {
    %c0_i32 = arith.constant 0 : i32
    %c0_i32_0 = arith.constant 0 : i32
    %c0_i32_1 = arith.constant 0 : i32
    return %c0_i32, %c0_i32_0 : i32, i32
  }
  func.func @transform_3(%arg0: i32) -> (i32, i32) {
    %c0_i32 = arith.constant 0 : i32
    %c0_i32_0 = arith.constant 0 : i32
    %c0_i32_1 = arith.constant 0 : i32
    return %c0_i32, %c0_i32_0 : i32, i32
  }
  func.func @transform_4(%arg0: i32) -> (i32, i32) {
    %c0_i32 = arith.constant 0 : i32
    %c0_i32_0 = arith.constant 0 : i32
    %c0_i32_1 = arith.constant 0 : i32
    return %c0_i32, %c0_i32_0 : i32, i32
  }
  func.func @transform_5(%arg0: i32) -> (i32, i32) {
    %c0_i32 = arith.constant 0 : i32
    %c0_i32_0 = arith.constant 0 : i32
    return %arg0, %c0_i32 : i32, i32
  }
}

</mosaic_0001>

<bundles_post_ra>
// kernel: tpu_custom_call.1
= control target key start
LH: loop header
LB: loop body
LE: loop exit
PB: predicated region body
PF: predicated region fallthrough
CT: control target
= control target key end

     0   :  { %10 = vsyncpa [#allocation3], 0  ;;  %s941_s0 = inlined_call_operand.hbm [shape: f32[16,128], index: 0, kind: input, shape index: {}]   ;;  %s942_s1 = inlined_call_operand.hbm [shape: f32[128,128], index: 1, kind: input, shape index: {}]   ;;  %s943_s2 = inlined_call_operand.vmem [shape: f32[1,128], index: 2, kind: input, shape index: {}]   ;;  %s944_s3 = inlined_call_operand.hbm [shape: f32[256,128], index: 3, kind: input, shape index: {}]   ;;  %s945_s4 = inlined_call_operand.vmem [shape: f32[1,128], index: 4, kind: input, shape index: {}]   ;;  %s946_s5 = inlined_call_operand.hbm [shape: f32[16,128], index: 5, kind: output, shape index: {}]  }
   0x1   :  { %12 = vsyncpa [#allocation3 + $0x1], 0 }
   0x2   :  { %13 = vsyncpa [#allocation6], 0 }
   0x3   :  { %14 = vsyncpa [#allocation4], 0 }
   0x4   :  { %16 = vsyncpa [#allocation4 + $0x1], 0  ;;  %s783_s18 = smov 0   ;;  %s785_s19 = smov 0  }
   0x5   :  { %s787_s20 = smov 0   ;;  %s789_s21 = smov 0  }
   0x6 LB: > { %s174_s24 = sshll.u32 %s942_s1, 4  ;;  %s807_s25 = sadd.s32 4294967295, %s747_s21   ;;  %s747_s21 = sphi %s789_s21, %s957_s21   ;;  %s743_s20 = sphi %s787_s20, %s956_s20   ;;  %s739_s19 = sphi %s785_s19, %s955_s19   ;;  %s735_s18 = sphi %s783_s18, %s954_s18   ;;  %s175_s24 = int_to_ptr.hbm [resolvable:$true] %s174_s24 }
   0x7   : > { %p501_p0 = scmp.ge.s32.totalorder %s747_s21, 1  ;;  %p43_p1 = scmp.eq.s32.totalorder %s807_s25, 0 }
   0x8   : > { %p163_p2 = scmp.lt.s32.totalorder %s747_s21, 3  ;;  %s749_s27 = smov [#allocation5]  }
   0x9   : > { %s176_s28 = sshll.u32 %s749_s27, 4  ;;  %s191_s6 = sshll.u32 %s944_s3, 4  ;;  %s177_s28 = int_to_ptr.vmem [resolvable:$true] %s176_s28  ;;  %s192_s6 = int_to_ptr.hbm [resolvable:$true] %s191_s6 }
   0xa   : > { %p812_p3 = pnand %p501_p0, %p163_p2  ;;  %s750_s7 = smov [#allocation7]  }
   0xb   : > { %s193_s8 = sshll.u32 %s750_s7, 4  ;;  %s751_s9 = smov 128   ;;  %s194_s8 = int_to_ptr.vmem [resolvable:$true] %s193_s8 }
   0xc   : > { %p528_p4 = pneg %p812_p3  ;;  %s752_s10 = smov 8  }
   0xd   : > { %s500_s11 = sadd.s32 4294967294, %s747_s21   ;;  %s826_s12 = sadd.s32 1, %s747_s21  }
   0xe   : > { %p529_p6 = pnand %p528_p4, %p43_p1  ;;  %s26_s13 = ssub.s32 %s747_s21, %s826_s12 }
   0xf   : > { %s29_s14 = sadd.s32 1, %s743_s20  ;;  %p27_p7 = scmp.eq.s32.totalorder %s26_s13, 0 }
  0x10   : > { %531 = dma.hbm_to_vmem [thread:$0]  (!%p529_p6), %s175_s24, 2048, %s177_s28, [#allocation6], %s751_s9, %s751_s9, %s752_s10  }
  0x11   : > { %534 = dma.hbm_to_vmem [thread:$0]  (!%p529_p6), %s192_s6, 4096, %s194_s8, [#allocation6], %s751_s9, %s751_s9, %s752_s10  }
  0x12   : > { %p36_p8 = scmp.ne.s32.totalorder %s743_s20, %s739_s19  ;;  %p37_p9 = scmp.eq.s32.totalorder %s747_s21, 0 }
  0x13   : > { %p42_p10 = scmp.ne.s32.totalorder %s739_s19, %s735_s18  ;;  %p150_p13 = scmp.eq.s32.totalorder %s807_s25, 1 }
  0x14   : > { %s837_s15 = scalar_select %p27_p7, %s743_s20, %s29_s14  }
  0x15   : > { %p839_p11 = por %p37_p9, %p36_p8  ;;  %p845_p12 = por %p43_p1, %p42_p10 }
  0x16   : > { %p156_p0 = scmp.eq.s32.totalorder %s500_s11, 1  ;;  %p545_p2 = scmp.lt.s32.totalorder %s747_s21, 2 }
  0x17   : > { %s210_s22 = sand.u32 1, %s743_s20   ;;  %p852_p4 = por %p150_p13, %p36_p8 }
  0x18   : > { %p856_p6 = por %p156_p0, %p42_p10  ;;  %s505_s27 = sshll.u32 %s210_s22, 3 }
  0x19   : > { %s506_s28 = sshll.u32 %s747_s21, 3  ;;  %s214_s7 = scalar_lea.vmem [#allocation2], %s505_s27 }
  0x1a   : > { %s218_s6 = scalar_lea.hbm %s941_s0, %s506_s28  ;;  %s222_s8 = sshll.u32 %s214_s7, 4  ;;  %s223_s8 = int_to_ptr.vmem [resolvable:$true] %s222_s8 }
  0x1b   : > { %s220_s9 = sshll.u32 %s218_s6, 4  ;;  %p866_p7 = pnand %p545_p2, %p839_p11  ;;  %s221_s9 = int_to_ptr.hbm [resolvable:$true] %s220_s9 }
  0x1c   : > { %s211_s11 = scalar_lea.sflag [#allocation3], %s210_s22  ;;  %s647_s13 = sshra.s32 %s221_s9, 4  ;;  %s648_s13 = int_to_ptr.hbm [resolvable:$true] %s647_s13 }
  0x1d   : > { %s649_s14 = scalar_lea.hbm %s648_s13, 8  ;;  %p651_p9 = pneg %p866_p7 }
  0x1e   : > { %p650_p8 = scmp.ne.s32.totalorder %s648_s13, %s649_s14  ;;  %s654_s29 = scalar_lea.hbm %s941_s0, 16 }
  0x1f   : > { %p655_p11 = scmp.lt.s32.totalorder %s648_s13, %s941_s0  ;;  %p656_p0 = scmp.lt.s32.totalorder %s654_s29, %s649_s14 }
  0x20   : > { %p652_p10 = pnand %p651_p9, %p650_p8 }
  0x21   : > { %p657_p2 = por %p656_p0, %p655_p11 }
  0x22   : > { %p653_p13 = pneg %p652_p10 }
  0x24   : > { %p658_p5 = pnand %p657_p2, %p653_p13 }
  0x26   : > { %661 = shalt.err (!%p658_p5)
}
  0x27   : > { %538 = dma.hbm_to_vmem [thread:$0]  (!%p866_p7), %s221_s9, 128, %s223_s8, %s211_s11  }
  0x28   : > { %231 = sbr.rel (%p812_p3) target bundleno = 343 (0x157), region = 40  ;;  %s883_s22 = sand.u32 (!%p812_p3), 1, %s739_s19  }
  0x29   : > { %s508_s6 = sshll.u32 (!%p812_p3), %s883_s22, 3  ;;  %s234_s7 = scalar_lea.sflag (!%p812_p3), [#allocation3], %s883_s22 }
  0x2a   : > { %s889_s13 = scalar_lea.vmem (!%p812_p3), [#allocation2], %s508_s6 }
  0x2d   : > { %722 = dma.done.wait (%p845_p12), %s234_s7, 128  }
  0x2e   : > { %724 = vsyncadd (%p845_p12), %s234_s7, 4294967168 }
  0x2f   : > { %726 = dma.done.wait (%p43_p1), [#allocation6], 6144  }
  0x30   : > { %728 = vsyncadd (%p43_p1), [#allocation6], 4294961152  ;;  %v292_v0 = vld [vmem:[#allocation5 + $0x78] sm:$0xff]  ;;  %v291_v1 = vld [vmem:[#allocation5 + $0x70] sm:$0xff]  ;;  %s513_s8 = sshll.u32 %s807_s25, 3  ;;  %s274_s28 = scalar_lea.vmem [#allocation8], %s508_s6 }
  0x31   : > { %297 = vmatpush.msra.mxu0 %v292_v0  ;;  %v290_v2 = vld [vmem:[#allocation5 + $0x68] sm:$0xff]  ;;  %v289_v3 = vld [vmem:[#allocation5 + $0x60] sm:$0xff]  ;;  %v349_v4 = vld [vmem:[#allocation7 + $0xf8] sm:$0xff]  ;;  %s406_s27 = scalar_lea.hbm %s946_s5, %s513_s8  ;;  %s408_s29 = sshll.u32 %s274_s28, 4  ;;  %s409_s29 = int_to_ptr.vmem [resolvable:$true] %s408_s29 }
  0x32   : > { %v288_v5 = vld [vmem:[#allocation5 + $0x58] sm:$0xff]  ;;  %374 = vmatpush.msra.mxu2 %v349_v4  ;;  %v348_v6 = vld [vmem:[#allocation7 + $0xf0] sm:$0xff]  ;;  %v347_v8 = vld [vmem:[#allocation7 + $0xe8] sm:$0xff]  ;;  %s410_s30 = sshll.u32 %s406_s27, 4  ;;  %s396_s25 = scalar_lea.sflag [#allocation4], %s883_s22  ;;  %s411_s30 = int_to_ptr.hbm [resolvable:$true] %s410_s30 }
  0x33   : > { %298 = vmatpush.msra.mxu0 %v291_v1  ;;  %v333_v7 = vld [vmem:[#allocation7 + $0x78] sm:$0xff]  ;;  %v332_v9 = vld [vmem:[#allocation7 + $0x70] sm:$0xff]  ;;  %v331_v11 = vld [vmem:[#allocation7 + $0x68] sm:$0xff]  ;;  %s691_s16 = sshra.s32 %s411_s30, 4  ;;  %s697_s17 = scalar_lea.hbm %s946_s5, 16  ;;  %s692_s16 = int_to_ptr.hbm [resolvable:$true] %s691_s16 }
  0x34   : > { %354 = vmatpush.msra.mxu1 %v333_v7  ;;  %v287_v10 = vld [vmem:[#allocation5 + $0x50] sm:$0xff]  ;;  %375 = vmatpush.msra.mxu2 %v348_v6  ;;  %v346_v12 = vld [vmem:[#allocation7 + $0xe0] sm:$0xff]  ;;  %v286_v13 = vld [vmem:[#allocation5 + $0x48] sm:$0xff]  ;;  %s693_s7 = scalar_lea.hbm %s692_s16, 8  ;;  %p698_p12 = scmp.lt.s32.totalorder %s692_s16, %s946_s5 }
  0x35   : > { %299 = vmatpush.msra.mxu0 %v290_v2  ;;  %v330_v14 = vld [vmem:[#allocation7 + $0x60] sm:$0xff]  ;;  %v345_v15 = vld [vmem:[#allocation7 + $0xd8] sm:$0xff]  ;;  %v344_v18 = vld [vmem:[#allocation7 + $0xd0] sm:$0xff]  ;;  %p694_p1 = scmp.ne.s32.totalorder %s692_s16, %s693_s7  ;;  %p699_p7 = scmp.lt.s32.totalorder %s697_s17, %s693_s7 }
  0x36   : > { %355 = vmatpush.msra.mxu1 %v332_v9  ;;  %376 = vmatpush.msra.mxu2 %v347_v8  ;;  %v285_v16 = vld [vmem:[#allocation5 + $0x40] sm:$0xff]  ;;  %v329_v17 = vld [vmem:[#allocation7 + $0x58] sm:$0xff]  ;;  %v328_v20 = vld [vmem:[#allocation7 + $0x50] sm:$0xff] }
  0x37   : > { %300 = vmatpush.msra.mxu0 %v289_v3  ;;  %v284_v19 = vld [vmem:[#allocation5 + $0x38] sm:$0xff]  ;;  %v343_v21 = vld [vmem:[#allocation7 + $0xc8] sm:$0xff]  ;;  %v283_v22 = vld [vmem:[#allocation5 + $0x30] sm:$0xff]  ;;  %p695_p3 = pnand %p694_p1, %p852_p4  ;;  %p700_p8 = por %p699_p7, %p698_p12 }
  0x38   : > { %356 = vmatpush.msra.mxu1 %v331_v11  ;;  %377 = vmatpush.msra.mxu2 %v346_v12  ;;  %v327_v23 = vld [vmem:[#allocation7 + $0x48] sm:$0xff]  ;;  %v342_v24 = vld [vmem:[#allocation7 + $0xc0] sm:$0xff]  ;;  %v341_v27 = vld [vmem:[#allocation7 + $0xb8] sm:$0xff] }
  0x39   : > { %301 = vmatpush.msra.mxu0 %v288_v5  ;;  %v282_v25 = vld [vmem:[#allocation5 + $0x28] sm:$0xff]  ;;  %v326_v26 = vld [vmem:[#allocation7 + $0x40] sm:$0xff]  ;;  %v325_v29 = vld [vmem:[#allocation7 + $0x38] sm:$0xff]  ;;  %p696_p5 = pneg %p695_p3 }
  0x3a   : > { %357 = vmatpush.msra.mxu1 %v330_v14  ;;  %378 = vmatpush.msra.mxu2 %v345_v15  ;;  %v281_v28 = vld [vmem:[#allocation5 + $0x20] sm:$0xff]  ;;  %v340_v30 = vld [vmem:[#allocation7 + $0xb0] sm:$0xff]  ;;  %v280_v31 = vld [vmem:[#allocation5 + $0x18] sm:$0xff] }
  0x3b   : > { %302 = vmatpush.msra.mxu0 %v287_v10  ;;  %v324_v32 = vld [vmem:[#allocation7 + $0x30] sm:$0xff]  ;;  %v339_v33 = vld [vmem:[#allocation7 + $0xa8] sm:$0xff]  ;;  %v338_v37 = vld [vmem:[#allocation7 + $0xa0] sm:$0xff]  ;;  %p701_p9 = pnand %p700_p8, %p696_p5 }
  0x3c   : > { %358 = vmatpush.msra.mxu1 %v329_v17  ;;  %379 = vmatpush.msra.mxu2 %v344_v18  ;;  %v279_v34 = vld [vmem:[#allocation5 + $0x10] sm:$0xff]  ;;  %v323_v35 = vld [vmem:[#allocation7 + $0x28] sm:$0xff]  ;;  %v322_v39 = vld [vmem:[#allocation7 + $0x20] sm:$0xff] }
  0x3d   : > { %303 = vmatpush.msra.mxu0 %v286_v13  ;;  %v275_v36 = vld [vmem:[%s889_s13] sm:$0xff]  ;;  %v278_v38 = vld [vmem:[#allocation5 + $0x8] sm:$0xff]  ;;  %v277_v41 = vld [vmem:[#allocation5] sm:$0xff] }
  0x3e   : > { %359 = vmatpush.msra.mxu1 %v328_v20  ;;  %380 = vmatpush.msra.mxu2 %v343_v21  ;;  %v337_v40 = vld [vmem:[#allocation7 + $0x98] sm:$0xff]  ;;  %v276_v42 = vmax.f32 %v275_v36, 0.0  ;;  %v336_v44 = vld [vmem:[#allocation7 + $0x90] sm:$0xff]  ;;  %v335_v45 = vld [vmem:[#allocation7 + $0x88] sm:$0xff] }
  0x3f   : > { %304 = vmatpush.msra.mxu0 %v285_v16  ;;  %v321_v43 = vld [vmem:[#allocation7 + $0x18] sm:$0xff]  ;;  %v320_v46 = vld [vmem:[#allocation7 + $0x10] sm:$0xff]  ;;  %v334_v47 = vld [vmem:[#allocation7 + $0x80] sm:$0xff] }
  0x40   : > { %360 = vmatpush.msra.mxu1 %v327_v23  ;;  %381 = vmatpush.msra.mxu2 %v342_v24  ;;  %v319_v48 = vld [vmem:[#allocation7 + $0x8] sm:$0xff]  ;;  %v318_v49 = vld [vmem:[#allocation7] sm:$0xff]  ;;  %v585_v50 = vld [vmem:[%s943_s2] ss:$0 sm:$0xff] }
  0x41   : > { %305 = vmatpush.msra.mxu0 %v284_v19  ;;  %v586_v54 = vld [vmem:[%s945_s4] ss:$0 sm:$0xff] }
  0x42   : > { %361 = vmatpush.msra.mxu1 %v326_v26  ;;  %382 = vmatpush.msra.mxu2 %v341_v27 }
  0x43   : > { %306 = vmatpush.msra.mxu0 %v283_v22 }
  0x44   : > { %362 = vmatpush.msra.mxu1 %v325_v29  ;;  %383 = vmatpush.msra.mxu2 %v340_v30 }
  0x45   : > { %307 = vmatpush.msra.mxu0 %v282_v25 }
  0x46   : > { %363 = vmatpush.msra.mxu1 %v324_v32  ;;  %384 = vmatpush.msra.mxu2 %v339_v33 }
  0x47   : > { %308 = vmatpush.msra.mxu0 %v281_v28 }
  0x48   : > { %364 = vmatpush.msra.mxu1 %v323_v35  ;;  %385 = vmatpush.msra.mxu2 %v338_v37 }
  0x49   : > { %309 = vmatpush.msra.mxu0 %v280_v31 }
  0x4a   : > { %365 = vmatpush.msra.mxu1 %v322_v39  ;;  %386 = vmatpush.msra.mxu2 %v337_v40 }
  0x4b   : > { %310 = vmatpush.msra.mxu0 %v279_v34 }
  0x4c   : > { %366 = vmatpush.msra.mxu1 %v321_v43  ;;  %387 = vmatpush.msra.mxu2 %v336_v44 }
  0x4d   : > { %311 = vmatpush.msra.mxu0 %v278_v38 }
  0x4e   : > { %388 = vmatpush.msra.mxu2 %v335_v45  ;;  %367 = vmatpush.msra.mxu1 %v320_v46 }
  0x4f   : > { %312 = vmatpush.msra.mxu0 %v277_v41 }
  0x50   : > { %313 = vmatmul.f32.vlgmr.msra.gmra.mxu0 %v276_v42  ;;  %389 = vmatpush.msra.mxu2 %v334_v47 }
  0x51   : > { %390 = vmatmul.f32.vlgmr.msra.gmra.mxu2 %v275_v36  ;;  %368 = vmatpush.msra.mxu1 %v319_v48 }
  0x53   : > { %369 = vmatpush.msra.mxu1 %v318_v49 }
  0xcd   : > { %v314_v51 = vpop.f32.mrf.mxu0 }
  0xce   : > { %v315_v52 = vadd.f32 %v585_v50, %v314_v51 }
  0xd0   : > { %v317_v53 = vmax.f32 %v315_v52, 0.0 }
  0xd2   : > { %370 = vmatmul.f32.vlgmr.msra.gmra.mxu1 %v317_v53 }
  0xd4   : > { %v391_v56 = vpop.f32.mrf.mxu2 }
 0x14f   : > { %v371_v55 = vpop.f32.mrf.mxu1 }
 0x150   : > { %v372_v57 = vadd.f32 %v586_v54, %v371_v55 }
 0x152   : > { %v392_v58 = vadd.f32 %v391_v56, %v372_v57 }
 0x154   : > { %394 = vst [vmem:[%s274_s28] sm:$0xff] %v392_v58 }
 0x155   : > { %704 = shalt.err (!%p701_p9)
}
 0x156   : > { %526 = dma.vmem_to_hbm [thread:$0]  (%p852_p4), %s409_s29, 128, %s411_s30, %s396_s25  }
 0x157 PF: > { %s422_s22 = sand.u32 1, %s735_s18   ;;  %p953_p10 = scmp.ge.s32.totalorder %s747_s21, 2 }
 0x158   : > { %s423_s9 = scalar_lea.sflag [#allocation4], %s422_s22 }
 0x159   : > { %p540_p13 = pnand %p953_p10, %p856_p6 }
 0x15b   : > { %p541_p11 = pneg %p540_p13 }
 0x15d   : > { %730 = dma.done.wait (%p541_p11), %s423_s9, 128  }
 0x15e   : > { %732 = vsyncadd (%p541_p11), %s423_s9, 4294967168  ;;  %p19_p0 = scmp.ge.s32.totalorder %s826_s12, 4   ;;  %s954_s18 = smov %s739_s19 }
 0x15f   : > { %s955_s19 = smov %s743_s20  ;;  %s956_s20 = smov %s837_s15 }
 0x160   : > { %s957_s21 = smov %s826_s12  ;;  %21 = sbr.rel (!%p19_p0) target bundleno = 6 (0x6), region = 93 }
 0x165   :  { %429 = vsyncpa [#allocation3], 1 }
 0x166   :  { %431 = vsyncpa [#allocation3 + $0x1], 1 }
 0x167   :  { %432 = vsyncpa [#allocation6], 1 }
 0x168   :  { %433 = vsyncpa [#allocation4], 1 }
 0x169   :  { %435 = vsyncpa [#allocation4 + $0x1], 1 }

</bundles_post_ra>
